<compile_context>
chip_gen: v5e
topology: v5e:2x2
jax: 0.10.0
libtpu: 0.0.40
codegen_flags: <defaults>
</compile_context>

<pallas_src>
import jax
import jax.numpy as jnp
from jax.experimental import pallas as pl
from jax.experimental.pallas import tpu as pltpu

_LANES = 128
_GROUPS_PER_TILE = 8          # 8 * 128 = 1024 rows per grid step (>= 512-row sweet spot)


def _linear_kernel(x_ref, w_ref, b_ref, o_ref):
    # x_ref: (rows, 128, D) VMEM   -- one batch tile, feature dim on lanes
    # w_ref: (1, D)         VMEM   -- pinned (same block every grid step)
    # b_ref: (1,)           SMEM   -- scalar bias
    # o_ref: (rows, 128)    VMEM   -- lane-dense output tile
    prod = x_ref[...] * w_ref[...]                     # VPU: (rows, 128, D)
    o_ref[...] = jnp.sum(prod, axis=-1) + b_ref[0]     # XLU lane-reduce -> (rows, 128)


def _round_up(n, m):
    return ((n + m - 1) // m) * m


def binary_classifier_forward(x, weights, bias):
    """Pallas TPU equivalent of `self.linear(x).reshape(-1)`.

    x: (N, D) float, weights: (1, D) (already L2-normalized), bias: () or (1,).
    Returns (N,) float32.
    """
    N, D = x.shape
    x = x.astype(jnp.float32)
    w = weights.reshape(1, D).astype(jnp.float32)
    b = jnp.asarray(bias, jnp.float32).reshape(1)

    # Pad the batch to whole 128-row lane groups, then to whole tiles.
    # Small batches get a single grid step (block == full array, so the
    # (8,128) tiling rule is satisfied either way).
    groups = _round_up(N, _LANES) // _LANES
    if groups <= _GROUPS_PER_TILE:
        rows_per_tile = groups
    else:
        rows_per_tile = _GROUPS_PER_TILE
        groups = _round_up(groups, _GROUPS_PER_TILE)
    n_pad = groups * _LANES
    if n_pad != N:
        x = jnp.pad(x, ((0, n_pad - N), (0, 0)))

    # (N_pad, D) -> (groups, 128, D): free row-major metadata reshape in XLA;
    # each grid step then pulls a contiguous (rows_per_tile, 128, D) block.
    x3 = x.reshape(groups, _LANES, D)
    grid = (groups // rows_per_tile,)

    # Explicit VMEM budget: double-buffered x stream + output + pinned weights,
    # plus headroom. Stays inside v7x's 64 MiB physical VMEM for typical D.
    itemsize = 4
    vmem_need = (2 * rows_per_tile * _LANES * D * itemsize      # x double buffer
                 + 2 * rows_per_tile * _LANES * itemsize        # out double buffer
                 + 2 * D * itemsize                             # weights
                 + (1 << 20))                                   # headroom
    vmem_limit = min(max(vmem_need, 32 * 1024 * 1024), 64 * 1024 * 1024)

    out = pl.pallas_call(
        _linear_kernel,
        out_shape=jax.ShapeDtypeStruct((groups, _LANES), jnp.float32),
        grid=grid,
        in_specs=[
            pl.BlockSpec((rows_per_tile, _LANES, D), lambda i: (i, 0, 0)),  # x: streamed
            pl.BlockSpec((1, D), lambda i: (0, 0)),                         # w: pinned
            pl.BlockSpec(memory_space=pltpu.SMEM),                          # bias scalar
        ],
        out_specs=pl.BlockSpec((rows_per_tile, _LANES), lambda i: (i, 0)),
        compiler_params=pltpu.CompilerParams(
            dimension_semantics=("parallel",),      # batch tiles are independent
            vmem_limit_bytes=vmem_limit,
        ),
        cost_estimate=pl.CostEstimate(
            flops=2 * n_pad * D,
            transcendentals=0,
            bytes_accessed=n_pad * D * itemsize + n_pad * itemsize + D * itemsize,
        ),
    )(x3, w, b)

    # Glue: lane-dense (groups, 128) -> (N,), dropping padded rows, exactly
    # like `.reshape(-1)` in the torch module.
    return out.reshape(-1)[:N]


if __name__ == "__main__":
    key = jax.random.PRNGKey(0)
    k_w, k_b, k_x, k_x2 = jax.random.split(key, 4)

    # Small shapes consistent with the module: batch=8, feature dim=32.
    N, D = 8, 32

    # Deterministic "checkpoint": raw weights (1, D) and bias (1,), then the
    # same normalization BinaryClassifier.__init__ applies.
    raw_w = jax.random.normal(k_w, (1, D), dtype=jnp.float32)
    raw_b = jax.random.normal(k_b, (1,), dtype=jnp.float32)
    norm = jnp.sqrt(jnp.sum(raw_w * raw_w))          # torch .norm(2)
    w = raw_w / norm
    b = raw_b / norm

    x = jax.random.normal(k_x, (N, D), dtype=jnp.float32)
    y = jax.block_until_ready(binary_classifier_forward(x, w, b))
    y_ref = (x @ w.T + b).reshape(-1)
    assert y.shape == (N,)
    assert jnp.allclose(y, y_ref, atol=1e-5, rtol=1e-5)

    # Also exercise the multi-tile (gridded, padded, pipelined) path.
    N2 = 2304
    x2 = jax.random.normal(k_x2, (N2, D), dtype=jnp.float32)
    y2 = jax.block_until_ready(binary_classifier_forward(x2, w, b))
    y2_ref = (x2 @ w.T + b).reshape(-1)
    assert y2.shape == (N2,)
    assert jnp.allclose(y2, y2_ref, atol=1e-4, rtol=1e-4)

    print("KERNEL_OK")
</pallas_src>

<mosaic_0001>
module attributes {stable_mosaic.version = 11 : i64} {
  func.func @_linear_kernel(%arg0: i32, %arg1: memref<1x128x32xf32, #tpu.memory_space<vmem>>, %arg2: memref<1x32xf32, #tpu.memory_space<vmem>>, %arg3: memref<1xf32, #tpu.memory_space<smem>>, %arg4: memref<1x128xf32, #tpu.memory_space<vmem>>) attributes {dimension_semantics = [#tpu.dimension_semantics<parallel>], iteration_bounds = array<i64: 1>, scalar_prefetch = 0 : i64, scratch_operands = 0 : i64, tpu.core_type = #tpu.core_type<tc>, window_params = [{transform_indices = @transform_0, window_bounds = array<i64: 1, 128, 32>}, {pipeline_mode = #tpu.pipeline_mode<synchronous>, transform_indices = @transform_1, window_bounds = array<i64: 1, 32>}, {transform_indices = @transform_2, window_bounds = array<i64: 1>}, {transform_indices = @transform_3, window_bounds = array<i64: 1, 128>}]} {
    %c0 = arith.constant 0 : index
    %c0_0 = arith.constant 0 : index
    %c0_1 = arith.constant 0 : index
    %0 = vector.load %arg1[%c0, %c0_0, %c0_1] : memref<1x128x32xf32, #tpu.memory_space<vmem>>, vector<1x128x32xf32>
    %c0_2 = arith.constant 0 : index
    %c0_3 = arith.constant 0 : index
    %1 = vector.load %arg2[%c0_2, %c0_3] : memref<1x32xf32, #tpu.memory_space<vmem>>, vector<1x32xf32>
    %2 = vector.shape_cast %1 : vector<1x32xf32> to vector<1x1x32xf32>
    %3 = vector.broadcast %2 : vector<1x1x32xf32> to vector<1x128x32xf32>
    %4 = arith.mulf %0, %3 : vector<1x128x32xf32>
    %cst = arith.constant dense<0.000000e+00> : vector<1x128xf32>
    %5 = vector.multi_reduction <add>, %4, %cst [2] : vector<1x128x32xf32> to vector<1x128xf32>
    %c0_4 = arith.constant 0 : index
    %6 = memref.load %arg3[%c0_4] : memref<1xf32, #tpu.memory_space<smem>>
    %7 = vector.broadcast %6 : f32 to vector<1x128xf32>
    %8 = arith.addf %5, %7 : vector<1x128xf32>
    %c0_5 = arith.constant 0 : index
    %c0_6 = arith.constant 0 : index
    %9 = vector.load %arg4[%c0_5, %c0_6] : memref<1x128xf32, #tpu.memory_space<vmem>>, vector<1x128xf32>
    tpu.vector_store %arg4[%c0_5, %c0_6], %8 {strides = array<i32>} : memref<1x128xf32, #tpu.memory_space<vmem>>, vector<1x128xf32>,
    return
  }
  func.func @transform_0(%arg0: i32) -> (i32, i32, i32) {
    %c0_i32 = arith.constant 0 : i32
    %c0_i32_0 = arith.constant 0 : i32
    %c0_i32_1 = arith.constant 0 : i32
    return %arg0, %c0_i32, %c0_i32_0 : i32, i32, i32
  }
  func.func @transform_1(%arg0: i32) -> (i32, i32) {
    %c0_i32 = arith.constant 0 : i32
    %c0_i32_0 = arith.constant 0 : i32
    %c0_i32_1 = arith.constant 0 : i32
    return %c0_i32, %c0_i32_0 : i32, i32
  }
  func.func @transform_2(%arg0: i32) -> i32 {
    %c0_i32 = arith.constant 0 : i32
    %c0_i32_0 = arith.constant 0 : i32
    return %c0_i32 : i32
  }
  func.func @transform_3(%arg0: i32) -> (i32, i32) {
    %c0_i32 = arith.constant 0 : i32
    %c0_i32_0 = arith.constant 0 : i32
    return %arg0, %c0_i32 : i32, i32
  }
}

</mosaic_0001>

<bundles_post_ra>
// kernel: tpu_custom_call.1
= control target key start
LH: loop header
LB: loop body
LE: loop exit
PB: predicated region body
PF: predicated region fallthrough
CT: control target
= control target key end

     0   :  { %vm52_vm0 = vcmask 261120   ;;  %s392_s0 = inlined_call_operand.vmem [shape: f32[1,128,32], index: 0, kind: input, shape index: {}]   ;;  %s393_s1 = inlined_call_operand.vmem [shape: f32[1,32], index: 1, kind: input, shape index: {}]   ;;  %s394_s2 = inlined_call_operand.<no memory space> [shape: f32[1], index: 2, kind: input, shape index: {}]   ;;  %s395_s3 = inlined_call_operand.hbm [shape: f32[1,128], index: 3, kind: output, shape index: {}]  }
   0x1   :  { %v16_v0 = vld [vmem:[%s392_s0] sm:$0xff]  ;;  %v18_v2 = vld [vmem:[%s392_s0 + $0x10] sm:$0xff]  ;;  %v17_v7 = vld [vmem:[%s392_s0 + $0x8] sm:$0xff] }
   0x2   :  { %v271_v1 = vld [vmem:[%s393_s1] ss:$0 sm:$0xff]  ;;  %v19_v8 = vld [vmem:[%s392_s0 + $0x18] sm:$0xff]  ;;  %v21_v12 = vld [vmem:[%s392_s0 + $0x28] sm:$0xff] }
   0x3   :  { %v20_v3 = vld [vmem:[%s392_s0 + $0x20] sm:$0xff]  ;;  %v36_v4 = vmul.f32 %v271_v1, %v16_v0  ;;  %v38_v5 = vmul.f32 %v271_v1, %v18_v2  ;;  %v37_v13 = vmul.f32 %v271_v1, %v17_v7  ;;  %v39_v14 = vmul.f32 %v271_v1, %v19_v8 }
   0x4   :  { %v40_v6 = vmul.f32 %v271_v1, %v20_v3 }
   0x5   :  { %v53_v9 = vsel %vm52_vm0, %v36_v4, 0.0  ;;  %v59_v10 = vsel %vm52_vm0, %v38_v5, 0.0 }
   0x6   :  { %v65_v11 = vsel %vm52_vm0, %v40_v6, 0.0  ;;  %54 = vadd.xlane.f32.xlu0 %v53_v9  ;;  %60 = vadd.xlane.f32.xlu1 %v59_v10 }
   0x7   :  { %66 = vadd.xlane.f32.xlu2 %v65_v11 }
   0x8   :  { %9 = vsyncpa [#allocation4], 0  ;;  %v41_v15 = vmul.f32 %v271_v1, %v21_v12  ;;  %v56_v16 = vsel %vm52_vm0, %v37_v13, 0.0  ;;  %v62_v17 = vsel %vm52_vm0, %v39_v14, 0.0  ;;  %v22_v19 = vld [vmem:[%s392_s0 + $0x30] sm:$0xff]  ;;  %v23_v20 = vld [vmem:[%s392_s0 + $0x38] sm:$0xff]  ;;  %v135_v51 = vlaneseq }
   0x9   :  { %v24_v21 = vld [vmem:[%s392_s0 + $0x40] sm:$0xff]  ;;  %v42_v22 = vmul.f32 %v271_v1, %v22_v19  ;;  %v43_v23 = vmul.f32 %v271_v1, %v23_v20  ;;  %v25_v28 = vld [vmem:[%s392_s0 + $0x48] sm:$0xff]  ;;  %v26_v29 = vld [vmem:[%s392_s0 + $0x50] sm:$0xff]  ;;  %v353_v53 = vstv %s394_s2  ;;  %vm140_vm1 = vcmask 130112   ;;  %s207_s1 = sshll.u32 %s395_s3, 4  ;;  %s208_s1 = int_to_ptr.hbm [resolvable:$true] %s207_s1 }
   0xa   :  { %v68_v18 = vsel %vm52_vm0, %v41_v15, 0.0  ;;  %v44_v24 = vmul.f32 %v271_v1, %v24_v21  ;;  %v27_v30 = vld [vmem:[%s392_s0 + $0x58] sm:$0xff]  ;;  %v45_v31 = vmul.f32 %v271_v1, %v25_v28  ;;  %v46_v32 = vmul.f32 %v271_v1, %v26_v29  ;;  %v28_v37 = vld [vmem:[%s392_s0 + $0x60] sm:$0xff]  ;;  %v29_v38 = vld [vmem:[%s392_s0 + $0x68] sm:$0xff] }
   0xb   :  { %v71_v25 = vsel %vm52_vm0, %v42_v22, 0.0  ;;  %v74_v26 = vsel %vm52_vm0, %v43_v23, 0.0  ;;  %v47_v33 = vmul.f32 %v271_v1, %v27_v30  ;;  %v30_v39 = vld [vmem:[%s392_s0 + $0x70] sm:$0xff]  ;;  %v48_v40 = vmul.f32 %v271_v1, %v28_v37  ;;  %v31_v46 = vld [vmem:[%s392_s0 + $0x78] sm:$0xff]  ;;  %s244_s0 = smov [#allocation3]  }
   0xc   :  { %v77_v27 = vsel %vm52_vm0, %v44_v24, 0.0  ;;  %v80_v34 = vsel %vm52_vm0, %v45_v31, 0.0  ;;  %v83_v35 = vsel %vm52_vm0, %v46_v32, 0.0  ;;  %v49_v41 = vmul.f32 %v271_v1, %v29_v38  ;;  %s205_s2 = sshll.u32 %s244_s0, 4  ;;  %s206_s2 = int_to_ptr.vmem [resolvable:$true] %s205_s2 }
   0xd   :  { %v86_v36 = vsel %vm52_vm0, %v47_v33, 0.0  ;;  %v50_v42 = vmul.f32 %v271_v1, %v30_v39  ;;  %v89_v43 = vsel %vm52_vm0, %v48_v40, 0.0  ;;  %v51_v47 = vmul.f32 %v271_v1, %v31_v46 }
   0xe   :  { %57 = vadd.xlane.f32.xlu0 %v56_v16  ;;  %63 = vadd.xlane.f32.xlu1 %v62_v17  ;;  %v92_v44 = vsel %vm52_vm0, %v49_v41, 0.0  ;;  %v355_v54 = vand.u32 127, %v135_v51  ;;  %vm144_vm2 = vcmask 195712   ;;  %vm148_vm3 = vcmask 261312  }
   0xf   :  { %69 = vadd.xlane.f32.xlu2 %v68_v18  ;;  %v95_v45 = vsel %vm52_vm0, %v50_v42, 0.0  ;;  %v98_v48 = vsel %vm52_vm0, %v51_v47, 0.0  ;;  %vm152_vm4 = vcmask 326912   ;;  %vm156_vm5 = vcmask 392512  }
  0x10   :  { %v138_v56 = vadd.s32 4294967288, %v355_v54  ;;  %v142_v57 = vadd.s32 4294967280, %v355_v54  ;;  %v146_v62 = vadd.s32 4294967272, %v355_v54  ;;  %v150_v6 = vadd.s32 4294967264, %v355_v54 }
  0x11   :  { %v154_v9 = vadd.s32 4294967256, %v355_v54  ;;  %v158_v11 = vadd.s32 4294967248, %v355_v54  ;;  %v162_v19 = vadd.s32 4294967240, %v355_v54  ;;  %vm160_vm6 = vcmask 458112  }
  0x12   :  { %v166_v23 = vadd.s32 4294967232, %v355_v54  ;;  %vm164_vm7 = vcmask 523712   ;;  %vm168_vm8 = vcmask 589312   ;;  %vm172_vm9 = vcmask 654912  }
  0x13   :  { %v178_v38 = vadd.s32 4294967208, %v355_v54  ;;  %vm176_vm10 = vcmask 720512   ;;  %vm180_vm11 = vcmask 786112   ;;  %vm184_vm12 = vcmask 851712  }
  0x14   :  { %vm188_vm13 = vcmask 917312   ;;  %vm192_vm14 = vcmask 982912   ;;  %vm196_vm15 = vcmask 1048512  }
  0x16   :  { %72 = vadd.xlane.f32.xlu0 %v71_v25  ;;  %75 = vadd.xlane.f32.xlu1 %v74_v26 }
  0x17   :  { %78 = vadd.xlane.f32.xlu2 %v77_v27  ;;  %v170_v27 = vadd.s32 4294967224, %v355_v54 }
  0x1e   :  { %81 = vadd.xlane.f32.xlu0 %v80_v34  ;;  %84 = vadd.xlane.f32.xlu1 %v83_v35  ;;  %v174_v34 = vadd.s32 4294967216, %v355_v54 }
  0x1f   :  { %87 = vadd.xlane.f32.xlu2 %v86_v36 }
  0x26   :  { %90 = vadd.xlane.f32.xlu0 %v89_v43  ;;  %93 = vadd.xlane.f32.xlu1 %v92_v44  ;;  %v182_v43 = vadd.s32 4294967200, %v355_v54 }
  0x27   :  { %96 = vadd.xlane.f32.xlu2 %v95_v45 }
  0x2e   :  { %99 = vadd.xlane.f32.xlu0 %v98_v48  ;;  %v186_v48 = vadd.s32 4294967192, %v355_v54 }
  0x79   :  { %v55_v49 = vpop.xlane.xlu0 %54  ;;  %v61_v50 = vpop.xlane.xlu1 %60 }
  0x7a   :  { %v67_v52 = vpop.xlane.xlu2 %66  ;;  %v103_v55 = vadd.f32 %v353_v53, %v55_v49  ;;  %v105_v58 = vadd.f32 %v353_v53, %v61_v50 }
  0x7b   :  { %v107_v7 = vadd.f32 %v353_v53, %v67_v52 }
  0x7c   :  { %v137_v1 = vperm.slane %v103_v55, %v355_v54  ;;  %v143_v3 = vperm.slane %v105_v58, %v142_v57  ;;  %v190_v55 = vadd.s32 4294967184, %v355_v54 }
  0x7d   :  { %v151_v17 = vperm.slane %v107_v7, %v150_v6 }
  0x81   :  { %v58_v59 = vpop.xlane.xlu0 %57  ;;  %v64_v60 = vpop.xlane.xlu1 %63 }
  0x82   :  { %v104_v61 = vadd.f32 %v353_v53, %v58_v59  ;;  %v106_v63 = vadd.f32 %v353_v53, %v64_v60  ;;  %v70_v0 = vpop.xlane.xlu2 %69  ;;  %v194_v60 = vadd.s32 4294967176, %v355_v54 }
  0x83   :  { %v108_v10 = vadd.f32 %v353_v53, %v70_v0 }
  0x84   :  { %v139_v2 = vperm.slane %v104_v61, %v138_v56  ;;  %v147_v5 = vperm.slane %v106_v63, %v146_v62 }
  0x85   :  { %v155_v18 = vperm.slane %v108_v10, %v154_v9 }
  0x86   :  { %v141_v4 = vsel %vm140_vm1, %v139_v2, %v137_v1 }
  0x87   :  { %v145_v8 = vsel %vm144_vm2, %v143_v3, %v141_v4 }
  0x88   :  { %v149_v14 = vsel %vm148_vm3, %v147_v5, %v145_v8 }
  0x89   :  { %v73_v12 = vpop.xlane.xlu0 %72  ;;  %v76_v13 = vpop.xlane.xlu1 %75  ;;  %v153_v21 = vsel %vm152_vm4, %v151_v17, %v149_v14 }
  0x8a   :  { %v109_v15 = vadd.f32 %v353_v53, %v73_v12  ;;  %v79_v16 = vpop.xlane.xlu2 %78  ;;  %v110_v20 = vadd.f32 %v353_v53, %v76_v13  ;;  %v157_v25 = vsel %vm156_vm5, %v155_v18, %v153_v21 }
  0x8b   :  { %v111_v24 = vadd.f32 %v353_v53, %v79_v16 }
  0x8c   :  { %v159_v22 = vperm.slane %v109_v15, %v158_v11  ;;  %v163_v26 = vperm.slane %v110_v20, %v162_v19 }
  0x8d   :  { %v167_v33 = vperm.slane %v111_v24, %v166_v23 }
  0x8e   :  { %v161_v28 = vsel %vm160_vm6, %v159_v22, %v157_v25 }
  0x8f   :  { %v165_v36 = vsel %vm164_vm7, %v163_v26, %v161_v28 }
  0x90   :  { %v169_v40 = vsel %vm168_vm8, %v167_v33, %v165_v36 }
  0x91   :  { %v82_v29 = vpop.xlane.xlu0 %81  ;;  %v85_v30 = vpop.xlane.xlu1 %84 }
  0x92   :  { %v112_v31 = vadd.f32 %v353_v53, %v82_v29  ;;  %v88_v32 = vpop.xlane.xlu2 %87  ;;  %v113_v35 = vadd.f32 %v353_v53, %v85_v30 }
  0x93   :  { %v114_v39 = vadd.f32 %v353_v53, %v88_v32 }
  0x94   :  { %v171_v37 = vperm.slane %v112_v31, %v170_v27  ;;  %v175_v41 = vperm.slane %v113_v35, %v174_v34 }
  0x95   :  { %v179_v46 = vperm.slane %v114_v39, %v178_v38 }
  0x96   :  { %v173_v42 = vsel %vm172_vm9, %v171_v37, %v169_v40 }
  0x97   :  { %v177_v51 = vsel %vm176_vm10, %v175_v41, %v173_v42 }
  0x98   :  { %v181_v57 = vsel %vm180_vm11, %v179_v46, %v177_v51 }
  0x99   :  { %v91_v44 = vpop.xlane.xlu0 %90  ;;  %v94_v45 = vpop.xlane.xlu1 %93 }
  0x9a   :  { %v115_v47 = vadd.f32 %v353_v53, %v91_v44  ;;  %v116_v49 = vadd.f32 %v353_v53, %v94_v45  ;;  %v97_v50 = vpop.xlane.xlu2 %96 }
  0x9b   :  { %v117_v56 = vadd.f32 %v353_v53, %v97_v50 }
  0x9c   :  { %v183_v52 = vperm.slane %v115_v47, %v182_v43  ;;  %v187_v58 = vperm.slane %v116_v49, %v186_v48 }
  0x9d   :  { %v191_v61 = vperm.slane %v117_v56, %v190_v55 }
  0x9e   :  { %v185_v59 = vsel %vm184_vm12, %v183_v52, %v181_v57 }
  0x9f   :  { %v189_v63 = vsel %vm188_vm13, %v187_v58, %v185_v59 }
  0xa0   :  { %v193_v2 = vsel %vm192_vm14, %v191_v61, %v189_v63 }
  0xa1   :  { %v100_v62 = vpop.xlane.xlu0 %99 }
  0xa2   :  { %v118_v0 = vadd.f32 %v353_v53, %v100_v62 }
  0xa4   :  { %v195_v1 = vperm.slane %v118_v0, %v194_v60 }
  0xa6   :  { %v197_v3 = vsel %vm196_vm15, %v195_v1, %v193_v2 }
  0xa7   :  { %199 = vst [vmem:[#allocation3] sm:$0x1] %v197_v3 }
  0xa8   :  { %210 = dma.vmem_to_hbm [thread:$0]  %s206_s2, 16, %s208_s1, [#allocation4]  }
  0xa9   :  { %242 = dma.done.wait [#allocation4], 16  }
  0xaa   :  { %243 = vsyncadd [#allocation4], 4294967280 }
  0xab   :  { %215 = vsyncpa [#allocation4], 1 }

</bundles_post_ra>
